<compile_context>
chip_gen: v6e
topology: v6e:2x2x1
jax: 0.10.0
libtpu: 0.0.40
codegen_flags: <defaults>
</compile_context>

<pallas_src>
import functools
import math

import jax
import jax.numpy as jnp
from jax.experimental import pallas as pl
from jax.experimental.pallas import tpu as pltpu


# --------------------------------------------------------------------------
# Kernel
# --------------------------------------------------------------------------
def _basic_block_kernel(*refs, H, W, S, L_pad, has_down):
    """One haloed row-strip of one batch element, both convs fused."""
    if has_down:
        (x_ref, w1_ref, b1_ref, w2_ref, b2_ref, wd_ref, bd_ref, o_ref) = refs
    else:
        (x_ref, w1_ref, b1_ref, w2_ref, b2_ref, o_ref) = refs

    x = x_ref[0, 0]                                   # (Cin, L_pad) f32
    r0 = pl.program_id(1) * S - 2                     # image row of strip-local row 0

    # --- in-kernel edge masks from a lane iota (nothing streamed from HBM) ---
    lane = jax.lax.broadcasted_iota(jnp.int32, (1, L_pad), 1)
    if (W & (W - 1)) == 0:                            # power-of-two W: bit ops
        col = lane & (W - 1)
        row = lane >> int(math.log2(W))
    else:
        # TODO(synk): vector int div/rem may not lower on every TPU gen;
        # precompute host-side row/col id tables if this ever trips.
        col = lane % W
        row = lane // W
    ok_l = col >= 1                                   # tap dx = -1 stays in-row
    ok_r = col <= W - 2                               # tap dx = +1 stays in-row
    grow = r0 + row                                   # global image row per lane
    row_ok = (grow >= 0) & (grow < H)                 # lane inside the image

    def conv3x3(v, w_ref):
        """'same' 3x3 conv on a flattened haloed strip: one MXU matmul.

        Builds the (9*C, L_pad) bf16 im2col slab in VMEM (roll + edge-select
        fused into the build), then a single K-stacked dot with f32 acc.
        Row-direction padding is physical zeros from the wrapper; wrapped
        lanes only land in strip rows that are later discarded.
        """
        taps = []
        for dy in (-1, 0, 1):
            for dx in (-1, 0, 1):
                sh = dy * W + dx
                t = v if sh == 0 else pltpu.roll(v, (-sh) % L_pad, 1)
                if dx != 0:                           # zero cross-row wrap lanes
                    t = jnp.where(ok_l if dx < 0 else ok_r, t, 0.0)
                taps.append(t.astype(jnp.bfloat16))
        im2col = jnp.concatenate(taps, axis=0)        # (9*C, L_pad) bf16
        return jax.lax.dot_general(                   # one MXU matmul
            w_ref[...], im2col, (((1,), (0,)), ((), ())),
            preferred_element_type=jnp.float32)       # (Cout, L_pad) f32

    # y = relu(bn1(conv1(x)))     (BN scale folded into w1, bias into b1)
    y = jnp.maximum(conv3x3(x, w1_ref) + b1_ref[...], 0.0)
    # conv2 zero-pads *its* input at image borders -> zero out-of-image rows.
    y = jnp.where(row_ok, y, 0.0)
    # y = relu(bn2(conv2(y)))
    y = jnp.maximum(conv3x3(y, w2_ref) + b2_ref[...], 0.0)

    inner = slice(2 * W, (S + 2) * W)                 # this strip's own rows
    y = y[:, inner]                                   # (Cout, S*W)
    x_in = x[:, inner]                                # (Cin,  S*W)

    # residual branch: identity, or bn3(conv1x1(x)) on the MXU
    if has_down:
        res = jax.lax.dot_general(
            wd_ref[...], x_in.astype(jnp.bfloat16),
            (((1,), (0,)), ((), ())),
            preferred_element_type=jnp.float32) + bd_ref[...]
    else:
        res = x_in

    o_ref[0] = jnp.maximum(res + y, 0.0)


# --------------------------------------------------------------------------
# Wrapper (plain-JAX glue: BN folding, halo-strip gather, layout plumbing)
# --------------------------------------------------------------------------
def _fold_bn(conv_bias, gamma, beta, mean, var, eps=1e-5):
    scale = gamma / jnp.sqrt(var + eps)               # (C,)
    bias = beta + scale * (conv_bias - mean)          # (C,)
    return scale, bias


def _fold_conv3x3(w_oihw, scale):
    # OIHW (Cout,Cin,3,3) * scale[cout] -> (Cout, 9*Cin) bf16,
    # column block k = (dy+1)*3 + (dx+1) matching the kernel's im2col order.
    w = w_oihw * scale[:, None, None, None]
    cout, cin = w.shape[0], w.shape[1]
    w = jnp.transpose(w, (0, 2, 3, 1)).reshape(cout, 9 * cin)
    return w.astype(jnp.bfloat16)


def _pick_strip_rows(H, W):
    """Largest strip height S dividing H with lane-dense S*W and >= 2 strips."""
    for S in range(max(H // 2, 1), 0, -1):
        if H % S == 0 and (S * W) % 128 == 0:
            return S
    return H                                          # fallback: whole image


def basic_block_pallas(x_nchw, params, in_planes, planes, stride=1):
    assert stride == 1, "TODO(synk): stride > 1 not implemented"
    N, Cin, H, W = x_nchw.shape
    assert Cin == in_planes

    S = _pick_strip_rows(H, W)
    n_strips = H // S
    L = (S + 4) * W                                   # haloed strip, flattened
    L_pad = ((L + 127) // 128) * 128                  # lane-dense strips

    # ---- haloed, flattened, zero-padded strips (wrapper-side plumbing) -----
    xp = jnp.pad(x_nchw, ((0, 0), (0, 0), (2, 2), (0, 0)))      # zero rows
    rows = (jnp.arange(n_strips) * S)[:, None] + jnp.arange(S + 4)[None, :]
    x_halo = xp[:, :, rows, :]                        # (N, Cin, n_strips, S+4, W)
    x_halo = jnp.transpose(x_halo, (0, 2, 1, 3, 4)).reshape(N, n_strips, Cin, L)
    if L_pad != L:
        x_halo = jnp.pad(x_halo, ((0, 0), (0, 0), (0, 0), (0, L_pad - L)))

    # ---- fold BatchNorm (eval) into bf16 weights / f32 biases --------------
    s1, b1 = _fold_bn(params["b1"], *params["bn1"])
    s2, b2 = _fold_bn(params["b2"], *params["bn2"])
    w1 = _fold_conv3x3(params["w1"], s1)              # (planes, 9*in_planes) bf16
    w2 = _fold_conv3x3(params["w2"], s2)              # (planes, 9*planes)    bf16
    b1 = b1.reshape(planes, 1)
    b2 = b2.reshape(planes, 1)

    has_down = not (stride == 1 and in_planes == planes)

    inputs = [x_halo, w1, b1, w2, b2]
    in_specs = [
        pl.BlockSpec((1, 1, Cin, L_pad), lambda n, s: (n, s, 0, 0)),
        pl.BlockSpec((planes, 9 * in_planes), lambda n, s: (0, 0)),
        pl.BlockSpec((planes, 1), lambda n, s: (0, 0)),
        pl.BlockSpec((planes, 9 * planes), lambda n, s: (0, 0)),
        pl.BlockSpec((planes, 1), lambda n, s: (0, 0)),
    ]
    if has_down:
        s3, b3 = _fold_bn(params["bd"], *params["bn3"])
        wd = (params["wd"][:, :, 0, 0] * s3[:, None]).astype(jnp.bfloat16)
        inputs += [wd, b3.reshape(planes, 1)]
        in_specs += [
            pl.BlockSpec((planes, in_planes), lambda n, s: (0, 0)),
            pl.BlockSpec((planes, 1), lambda n, s: (0, 0)),
        ]

    kernel = functools.partial(_basic_block_kernel, H=H, W=W, S=S,
                               L_pad=L_pad, has_down=has_down)
    out = pl.pallas_call(
        kernel,
        out_shape=jax.ShapeDtypeStruct((N, planes, H * W), jnp.float32),
        grid=(N, n_strips),
        in_specs=in_specs,
        out_specs=pl.BlockSpec((1, planes, S * W), lambda n, s: (n, 0, s)),
        compiler_params=pltpu.CompilerParams(
            dimension_semantics=("parallel", "parallel"),
            vmem_limit_bytes=32 * 1024 * 1024),
    )(*inputs)
    return out.reshape(N, planes, H, W)


# --------------------------------------------------------------------------
# Parameter setup (PyTorch-style init) and plain-JAX reference
# --------------------------------------------------------------------------
def _conv_init(key, cout, cin, ksz):
    kw, kb = jax.random.split(key)
    fan_in = cin * ksz * ksz
    bound = 1.0 / math.sqrt(fan_in)
    w = jax.random.uniform(kw, (cout, cin, ksz, ksz), jnp.float32,
                           -bound, bound)             # OIHW like PyTorch
    b = jax.random.uniform(kb, (cout,), jnp.float32, -bound, bound)
    return w, b


def _bn_init(key, c):
    kg, kb, km, kv = jax.random.split(key, 4)
    gamma = 1.0 + 0.1 * jax.random.normal(kg, (c,), jnp.float32)
    beta = 0.1 * jax.random.normal(kb, (c,), jnp.float32)
    mean = 0.1 * jax.random.normal(km, (c,), jnp.float32)
    var = 1.0 + 0.2 * jax.random.uniform(kv, (c,), jnp.float32)
    return (gamma, beta, mean, var)


def init_basic_block_params(key, in_planes, planes, stride=1):
    k1, k2, k3, k4, k5, k6 = jax.random.split(key, 6)
    p = {}
    p["w1"], p["b1"] = _conv_init(k1, planes, in_planes, 3)
    p["bn1"] = _bn_init(k2, planes)
    p["w2"], p["b2"] = _conv_init(k3, planes, planes, 3)
    p["bn2"] = _bn_init(k4, planes)
    if not (stride == 1 and in_planes == planes):
        p["wd"], p["bd"] = _conv_init(k5, planes, in_planes, 1)
        p["bn3"] = _bn_init(k6, planes)
    return p


def basic_block_reference(x_nchw, params, in_planes, planes, eps=1e-5):
    prec = jax.lax.Precision.HIGHEST

    def conv(x, w_oihw, b, pad):
        y = jax.lax.conv_general_dilated(
            x, w_oihw, (1, 1), [(pad, pad), (pad, pad)],
            dimension_numbers=("NCHW", "OIHW", "NCHW"), precision=prec)
        return y + b[None, :, None, None]

    def bn(x, gamma, beta, mean, var):
        inv = gamma / jnp.sqrt(var + eps)
        return ((x - mean[None, :, None, None]) * inv[None, :, None, None]
                + beta[None, :, None, None])

    relu = lambda v: jnp.maximum(v, 0.0)
    y = relu(bn(conv(x_nchw, params["w1"], params["b1"], 1), *params["bn1"]))
    y = relu(bn(conv(y, params["w2"], params["b2"], 1), *params["bn2"]))
    if in_planes == planes:
        res = x_nchw
    else:
        res = bn(conv(x_nchw, params["wd"], params["bd"], 0), *params["bn3"])
    return relu(res + y)


# --------------------------------------------------------------------------
# Main
# --------------------------------------------------------------------------
if __name__ == "__main__":
    key = jax.random.PRNGKey(0)
    N, H, W = 2, 16, 16

    # (in_planes != planes) exercises the 1x1-conv+bn3 downsample branch,
    # (in_planes == planes) exercises the identity-residual branch.
    for (cin, cout) in ((4, 8), (8, 8)):
        key, kx, kp = jax.random.split(key, 3)
        x = jax.random.normal(kx, (N, cin, H, W), jnp.float32)   # NCHW
        params = init_basic_block_params(kp, cin, cout, stride=1)

        out = basic_block_pallas(x, params, cin, cout, stride=1)
        out = jax.block_until_ready(out)

        ref = basic_block_reference(x, params, cin, cout)
        assert out.shape == (N, cout, H, W)
        max_err = float(jnp.max(jnp.abs(out - ref)))
        # bf16 MXU operands (f32 accumulation) vs a Precision.HIGHEST f32 ref.
        assert jnp.allclose(out, ref, atol=5e-2, rtol=5e-2), \
            f"mismatch vs reference (cin={cin}, cout={cout}), max err {max_err}"

    print("KERNEL_OK")
</pallas_src>

<mosaic_0001>
module attributes {stable_mosaic.version = 11 : i64} {
  func.func @_basic_block_kernel(%arg0: i32, %arg1: i32, %arg2: memref<1x1x4x256xf32, #tpu.memory_space<vmem>>, %arg3: memref<8x36xbf16, #tpu.memory_space<vmem>>, %arg4: memref<8x1xf32, #tpu.memory_space<vmem>>, %arg5: memref<8x72xbf16, #tpu.memory_space<vmem>>, %arg6: memref<8x1xf32, #tpu.memory_space<vmem>>, %arg7: memref<8x4xbf16, #tpu.memory_space<vmem>>, %arg8: memref<8x1xf32, #tpu.memory_space<vmem>>, %arg9: memref<1x8x128xf32, #tpu.memory_space<vmem>>) attributes {dimension_semantics = [#tpu.dimension_semantics<parallel>, #tpu.dimension_semantics<parallel>], iteration_bounds = array<i64: 2, 2>, scalar_prefetch = 0 : i64, scratch_operands = 0 : i64, tpu.core_type = #tpu.core_type<tc>, window_params = [{transform_indices = @transform_0, window_bounds = array<i64: 1, 1, 4, 256>}, {pipeline_mode = #tpu.pipeline_mode<synchronous>, transform_indices = @transform_1, window_bounds = array<i64: 8, 36>}, {pipeline_mode = #tpu.pipeline_mode<synchronous>, transform_indices = @transform_2, window_bounds = array<i64: 8, 1>}, {pipeline_mode = #tpu.pipeline_mode<synchronous>, transform_indices = @transform_3, window_bounds = array<i64: 8, 72>}, {pipeline_mode = #tpu.pipeline_mode<synchronous>, transform_indices = @transform_4, window_bounds = array<i64: 8, 1>}, {pipeline_mode = #tpu.pipeline_mode<synchronous>, transform_indices = @transform_5, window_bounds = array<i64: 8, 4>}, {pipeline_mode = #tpu.pipeline_mode<synchronous>, transform_indices = @transform_6, window_bounds = array<i64: 8, 1>}, {transform_indices = @transform_7, window_bounds = array<i64: 1, 8, 128>}]} {
    %c0 = arith.constant 0 : index
    %c0_0 = arith.constant 0 : index
    %c0_1 = arith.constant 0 : index
    %c0_2 = arith.constant 0 : index
    %0 = vector.load %arg2[%c0, %c0_0, %c0_1, %c0_2] : memref<1x1x4x256xf32, #tpu.memory_space<vmem>>, vector<1x1x4x256xf32>
    %1 = vector.shape_cast %0 : vector<1x1x4x256xf32> to vector<4x256xf32>
    %c8_i32 = arith.constant 8 : i32
    %2 = arith.muli %arg1, %c8_i32 : i32
    %c2_i32 = arith.constant 2 : i32
    %3 = arith.subi %2, %c2_i32 : i32
    %4 = tpu.iota {dimensions = array<i32: 1>} : vector<1x256xi32>
    %c15_i32 = arith.constant 15 : i32
    %5 = vector.broadcast %c15_i32 : i32 to vector<1x256xi32>
    %6 = arith.andi %4, %5 : vector<1x256xi32>
    %c4_i32 = arith.constant 4 : i32
    %7 = vector.broadcast %c4_i32 : i32 to vector<1x256xi32>
    %8 = arith.shrsi %4, %7 : vector<1x256xi32>
    %c1_i32 = arith.constant 1 : i32
    %9 = vector.broadcast %c1_i32 : i32 to vector<1x256xi32>
    %10 = arith.cmpi sge, %6, %9 : vector<1x256xi32>
    %c14_i32 = arith.constant 14 : i32
    %11 = vector.broadcast %c14_i32 : i32 to vector<1x256xi32>
    %12 = arith.cmpi sle, %6, %11 : vector<1x256xi32>
    %13 = vector.broadcast %3 : i32 to vector<1x256xi32>
    %14 = arith.addi %13, %8 : vector<1x256xi32>
    %c0_i32 = arith.constant 0 : i32
    %15 = vector.broadcast %c0_i32 : i32 to vector<1x256xi32>
    %16 = arith.cmpi sge, %14, %15 : vector<1x256xi32>
    %c16_i32 = arith.constant 16 : i32
    %17 = vector.broadcast %c16_i32 : i32 to vector<1x256xi32>
    %18 = arith.cmpi slt, %14, %17 : vector<1x256xi32>
    %19 = arith.andi %16, %18 : vector<1x256xi1>
    %c17_i32 = arith.constant 17 : i32
    %20 = tpu.dynamic_rotate %1 by %c17_i32 dim 1 : vector<4x256xf32>, i32 -> vector<4x256xf32>
    %cst = arith.constant 0.000000e+00 : f32
    %21 = vector.shape_cast %10 : vector<1x256xi1> to vector<1x256xi1>
    %22 = vector.broadcast %21 : vector<1x256xi1> to vector<4x256xi1>
    %23 = vector.broadcast %cst : f32 to vector<4x256xf32>
    %24 = arith.select %22, %20, %23 : vector<4x256xi1>, vector<4x256xf32>
    %25 = arith.truncf %24 : vector<4x256xf32> to vector<4x256xbf16>
    %c16_i32_3 = arith.constant 16 : i32
    %26 = tpu.dynamic_rotate %1 by %c16_i32_3 dim 1 : vector<4x256xf32>, i32 -> vector<4x256xf32>
    %27 = arith.truncf %26 : vector<4x256xf32> to vector<4x256xbf16>
    %c15_i32_4 = arith.constant 15 : i32
    %28 = tpu.dynamic_rotate %1 by %c15_i32_4 dim 1 : vector<4x256xf32>, i32 -> vector<4x256xf32>
    %cst_5 = arith.constant 0.000000e+00 : f32
    %29 = vector.shape_cast %12 : vector<1x256xi1> to vector<1x256xi1>
    %30 = vector.broadcast %29 : vector<1x256xi1> to vector<4x256xi1>
    %31 = vector.broadcast %cst_5 : f32 to vector<4x256xf32>
    %32 = arith.select %30, %28, %31 : vector<4x256xi1>, vector<4x256xf32>
    %33 = arith.truncf %32 : vector<4x256xf32> to vector<4x256xbf16>
    %c1_i32_6 = arith.constant 1 : i32
    %34 = tpu.dynamic_rotate %1 by %c1_i32_6 dim 1 : vector<4x256xf32>, i32 -> vector<4x256xf32>
    %cst_7 = arith.constant 0.000000e+00 : f32
    %35 = vector.shape_cast %10 : vector<1x256xi1> to vector<1x256xi1>
    %36 = vector.broadcast %35 : vector<1x256xi1> to vector<4x256xi1>
    %37 = vector.broadcast %cst_7 : f32 to vector<4x256xf32>
    %38 = arith.select %36, %34, %37 : vector<4x256xi1>, vector<4x256xf32>
    %39 = arith.truncf %38 : vector<4x256xf32> to vector<4x256xbf16>
    %40 = arith.truncf %1 : vector<4x256xf32> to vector<4x256xbf16>
    %c255_i32 = arith.constant 255 : i32
    %41 = tpu.dynamic_rotate %1 by %c255_i32 dim 1 : vector<4x256xf32>, i32 -> vector<4x256xf32>
    %cst_8 = arith.constant 0.000000e+00 : f32
    %42 = vector.shape_cast %12 : vector<1x256xi1> to vector<1x256xi1>
    %43 = vector.broadcast %42 : vector<1x256xi1> to vector<4x256xi1>
    %44 = vector.broadcast %cst_8 : f32 to vector<4x256xf32>
    %45 = arith.select %43, %41, %44 : vector<4x256xi1>, vector<4x256xf32>
    %46 = arith.truncf %45 : vector<4x256xf32> to vector<4x256xbf16>
    %c241_i32 = arith.constant 241 : i32
    %47 = tpu.dynamic_rotate %1 by %c241_i32 dim 1 : vector<4x256xf32>, i32 -> vector<4x256xf32>
    %cst_9 = arith.constant 0.000000e+00 : f32
    %48 = vector.shape_cast %10 : vector<1x256xi1> to vector<1x256xi1>
    %49 = vector.broadcast %48 : vector<1x256xi1> to vector<4x256xi1>
    %50 = vector.broadcast %cst_9 : f32 to vector<4x256xf32>
    %51 = arith.select %49, %47, %50 : vector<4x256xi1>, vector<4x256xf32>
    %52 = arith.truncf %51 : vector<4x256xf32> to vector<4x256xbf16>
    %c240_i32 = arith.constant 240 : i32
    %53 = tpu.dynamic_rotate %1 by %c240_i32 dim 1 : vector<4x256xf32>, i32 -> vector<4x256xf32>
    %54 = arith.truncf %53 : vector<4x256xf32> to vector<4x256xbf16>
    %c239_i32 = arith.constant 239 : i32
    %55 = tpu.dynamic_rotate %1 by %c239_i32 dim 1 : vector<4x256xf32>, i32 -> vector<4x256xf32>
    %cst_10 = arith.constant 0.000000e+00 : f32
    %56 = vector.shape_cast %12 : vector<1x256xi1> to vector<1x256xi1>
    %57 = vector.broadcast %56 : vector<1x256xi1> to vector<4x256xi1>
    %58 = vector.broadcast %cst_10 : f32 to vector<4x256xf32>
    %59 = arith.select %57, %55, %58 : vector<4x256xi1>, vector<4x256xf32>
    %60 = arith.truncf %59 : vector<4x256xf32> to vector<4x256xbf16>
    %61 = tpu.concatenate %25, %27, %33, %39, %40, %46, %52, %54, %60 in 0 : vector<4x256xbf16>, vector<4x256xbf16>, vector<4x256xbf16>, vector<4x256xbf16>, vector<4x256xbf16>, vector<4x256xbf16>, vector<4x256xbf16>, vector<4x256xbf16>, vector<4x256xbf16> -> vector<36x256xbf16>
    %c0_11 = arith.constant 0 : index
    %c0_12 = arith.constant 0 : index
    %62 = vector.load %arg3[%c0_11, %c0_12] : memref<8x36xbf16, #tpu.memory_space<vmem>>, vector<8x36xbf16>
    %cst_13 = arith.constant dense<0.000000e+00> : vector<8x256xf32>
    %63 = tpu.matmul %62, %61, %cst_13 {dimension_numbers = #tpu.dot_dimension_numbers<[1], [0], [0], [1], [0, 0, 1, 1], [], []>} : vector<8x36xbf16>, vector<36x256xbf16>, vector<8x256xf32> -> vector<8x256xf32>
    %c0_14 = arith.constant 0 : index
    %c0_15 = arith.constant 0 : index
    %64 = vector.load %arg4[%c0_14, %c0_15] : memref<8x1xf32, #tpu.memory_space<vmem>>, vector<8x1xf32>
    %65 = vector.broadcast %64 : vector<8x1xf32> to vector<8x256xf32>
    %66 = arith.addf %63, %65 : vector<8x256xf32>
    %cst_16 = arith.constant 0.000000e+00 : f32
    %67 = vector.broadcast %cst_16 : f32 to vector<8x256xf32>
    %68 = arith.maximumf %66, %67 : vector<8x256xf32>
    %cst_17 = arith.constant 0.000000e+00 : f32
    %69 = vector.shape_cast %19 : vector<1x256xi1> to vector<1x256xi1>
    %70 = vector.broadcast %69 : vector<1x256xi1> to vector<8x256xi1>
    %71 = vector.broadcast %cst_17 : f32 to vector<8x256xf32>
    %72 = arith.select %70, %68, %71 : vector<8x256xi1>, vector<8x256xf32>
    %c17_i32_18 = arith.constant 17 : i32
    %73 = tpu.dynamic_rotate %72 by %c17_i32_18 dim 1 : vector<8x256xf32>, i32 -> vector<8x256xf32>
    %cst_19 = arith.constant 0.000000e+00 : f32
    %74 = vector.shape_cast %10 : vector<1x256xi1> to vector<1x256xi1>
    %75 = vector.broadcast %74 : vector<1x256xi1> to vector<8x256xi1>
    %76 = vector.broadcast %cst_19 : f32 to vector<8x256xf32>
    %77 = arith.select %75, %73, %76 : vector<8x256xi1>, vector<8x256xf32>
    %78 = arith.truncf %77 : vector<8x256xf32> to vector<8x256xbf16>
    %c16_i32_20 = arith.constant 16 : i32
    %79 = tpu.dynamic_rotate %72 by %c16_i32_20 dim 1 : vector<8x256xf32>, i32 -> vector<8x256xf32>
    %80 = arith.truncf %79 : vector<8x256xf32> to vector<8x256xbf16>
    %c15_i32_21 = arith.constant 15 : i32
    %81 = tpu.dynamic_rotate %72 by %c15_i32_21 dim 1 : vector<8x256xf32>, i32 -> vector<8x256xf32>
    %cst_22 = arith.constant 0.000000e+00 : f32
    %82 = vector.shape_cast %12 : vector<1x256xi1> to vector<1x256xi1>
    %83 = vector.broadcast %82 : vector<1x256xi1> to vector<8x256xi1>
    %84 = vector.broadcast %cst_22 : f32 to vector<8x256xf32>
    %85 = arith.select %83, %81, %84 : vector<8x256xi1>, vector<8x256xf32>
    %86 = arith.truncf %85 : vector<8x256xf32> to vector<8x256xbf16>
    %c1_i32_23 = arith.constant 1 : i32
    %87 = tpu.dynamic_rotate %72 by %c1_i32_23 dim 1 : vector<8x256xf32>, i32 -> vector<8x256xf32>
    %cst_24 = arith.constant 0.000000e+00 : f32
    %88 = vector.shape_cast %10 : vector<1x256xi1> to vector<1x256xi1>
    %89 = vector.broadcast %88 : vector<1x256xi1> to vector<8x256xi1>
    %90 = vector.broadcast %cst_24 : f32 to vector<8x256xf32>
    %91 = arith.select %89, %87, %90 : vector<8x256xi1>, vector<8x256xf32>
    %92 = arith.truncf %91 : vector<8x256xf32> to vector<8x256xbf16>
    %93 = arith.truncf %72 : vector<8x256xf32> to vector<8x256xbf16>
    %c255_i32_25 = arith.constant 255 : i32
    %94 = tpu.dynamic_rotate %72 by %c255_i32_25 dim 1 : vector<8x256xf32>, i32 -> vector<8x256xf32>
    %cst_26 = arith.constant 0.000000e+00 : f32
    %95 = vector.shape_cast %12 : vector<1x256xi1> to vector<1x256xi1>
    %96 = vector.broadcast %95 : vector<1x256xi1> to vector<8x256xi1>
    %97 = vector.broadcast %cst_26 : f32 to vector<8x256xf32>
    %98 = arith.select %96, %94, %97 : vector<8x256xi1>, vector<8x256xf32>
    %99 = arith.truncf %98 : vector<8x256xf32> to vector<8x256xbf16>
    %c241_i32_27 = arith.constant 241 : i32
    %100 = tpu.dynamic_rotate %72 by %c241_i32_27 dim 1 : vector<8x256xf32>, i32 -> vector<8x256xf32>
    %cst_28 = arith.constant 0.000000e+00 : f32
    %101 = vector.shape_cast %10 : vector<1x256xi1> to vector<1x256xi1>
    %102 = vector.broadcast %101 : vector<1x256xi1> to vector<8x256xi1>
    %103 = vector.broadcast %cst_28 : f32 to vector<8x256xf32>
    %104 = arith.select %102, %100, %103 : vector<8x256xi1>, vector<8x256xf32>
    %105 = arith.truncf %104 : vector<8x256xf32> to vector<8x256xbf16>
    %c240_i32_29 = arith.constant 240 : i32
    %106 = tpu.dynamic_rotate %72 by %c240_i32_29 dim 1 : vector<8x256xf32>, i32 -> vector<8x256xf32>
    %107 = arith.truncf %106 : vector<8x256xf32> to vector<8x256xbf16>
    %c239_i32_30 = arith.constant 239 : i32
    %108 = tpu.dynamic_rotate %72 by %c239_i32_30 dim 1 : vector<8x256xf32>, i32 -> vector<8x256xf32>
    %cst_31 = arith.constant 0.000000e+00 : f32
    %109 = vector.shape_cast %12 : vector<1x256xi1> to vector<1x256xi1>
    %110 = vector.broadcast %109 : vector<1x256xi1> to vector<8x256xi1>
    %111 = vector.broadcast %cst_31 : f32 to vector<8x256xf32>
    %112 = arith.select %110, %108, %111 : vector<8x256xi1>, vector<8x256xf32>
    %113 = arith.truncf %112 : vector<8x256xf32> to vector<8x256xbf16>
    %114 = tpu.concatenate %78, %80, %86, %92, %93, %99, %105, %107, %113 in 0 : vector<8x256xbf16>, vector<8x256xbf16>, vector<8x256xbf16>, vector<8x256xbf16>, vector<8x256xbf16>, vector<8x256xbf16>, vector<8x256xbf16>, vector<8x256xbf16>, vector<8x256xbf16> -> vector<72x256xbf16>
    %c0_32 = arith.constant 0 : index
    %c0_33 = arith.constant 0 : index
    %115 = vector.load %arg5[%c0_32, %c0_33] : memref<8x72xbf16, #tpu.memory_space<vmem>>, vector<8x72xbf16>
    %cst_34 = arith.constant dense<0.000000e+00> : vector<8x256xf32>
    %116 = tpu.matmul %115, %114, %cst_34 {dimension_numbers = #tpu.dot_dimension_numbers<[1], [0], [0], [1], [0, 0, 1, 1], [], []>} : vector<8x72xbf16>, vector<72x256xbf16>, vector<8x256xf32> -> vector<8x256xf32>
    %c0_35 = arith.constant 0 : index
    %c0_36 = arith.constant 0 : index
    %117 = vector.load %arg6[%c0_35, %c0_36] : memref<8x1xf32, #tpu.memory_space<vmem>>, vector<8x1xf32>
    %118 = vector.broadcast %117 : vector<8x1xf32> to vector<8x256xf32>
    %119 = arith.addf %116, %118 : vector<8x256xf32>
    %cst_37 = arith.constant 0.000000e+00 : f32
    %120 = vector.broadcast %cst_37 : f32 to vector<8x256xf32>
    %121 = arith.maximumf %119, %120 : vector<8x256xf32>
    %122 = vector.extract_strided_slice %121 {offsets = [0, 32], sizes = [8, 128], strides = [1, 1]} : vector<8x256xf32> to vector<8x128xf32>
    %123 = vector.extract_strided_slice %1 {offsets = [0, 32], sizes = [4, 128], strides = [1, 1]} : vector<4x256xf32> to vector<4x128xf32>
    %c0_38 = arith.constant 0 : index
    %c0_39 = arith.constant 0 : index
    %124 = vector.load %arg7[%c0_38, %c0_39] : memref<8x4xbf16, #tpu.memory_space<vmem>>, vector<8x4xbf16>
    %125 = arith.truncf %123 : vector<4x128xf32> to vector<4x128xbf16>
    %cst_40 = arith.constant dense<0.000000e+00> : vector<8x128xf32>
    %126 = tpu.matmul %124, %125, %cst_40 {dimension_numbers = #tpu.dot_dimension_numbers<[1], [0], [0], [1], [0, 0, 1, 1], [], []>} : vector<8x4xbf16>, vector<4x128xbf16>, vector<8x128xf32> -> vector<8x128xf32>
    %c0_41 = arith.constant 0 : index
    %c0_42 = arith.constant 0 : index
    %127 = vector.load %arg8[%c0_41, %c0_42] : memref<8x1xf32, #tpu.memory_space<vmem>>, vector<8x1xf32>
    %128 = vector.broadcast %127 : vector<8x1xf32> to vector<8x128xf32>
    %129 = arith.addf %126, %128 : vector<8x128xf32>
    %130 = arith.addf %129, %122 : vector<8x128xf32>
    %cst_43 = arith.constant 0.000000e+00 : f32
    %131 = vector.broadcast %cst_43 : f32 to vector<8x128xf32>
    %132 = arith.maximumf %130, %131 : vector<8x128xf32>
    %c0_44 = arith.constant 0 : index
    %c0_45 = arith.constant 0 : index
    %c0_46 = arith.constant 0 : index
    %133 = vector.load %arg9[%c0_44, %c0_45, %c0_46] : memref<1x8x128xf32, #tpu.memory_space<vmem>>, vector<1x8x128xf32>
    %134 = vector.shape_cast %133 : vector<1x8x128xf32> to vector<8x128xf32>
    %135 = vector.shape_cast %132 : vector<8x128xf32> to vector<1x8x128xf32>
    tpu.vector_store %arg9[%c0_44, %c0_45, %c0_46], %135 {strides = array<i32>} : memref<1x8x128xf32, #tpu.memory_space<vmem>>, vector<1x8x128xf32>,
    return
  }
  func.func @transform_0(%arg0: i32, %arg1: i32) -> (i32, i32, i32, i32) {
    %c0_i32 = arith.constant 0 : i32
    %c0_i32_0 = arith.constant 0 : i32
    %c0_i32_1 = arith.constant 0 : i32
    return %arg0, %arg1, %c0_i32, %c0_i32_0 : i32, i32, i32, i32
  }
  func.func @transform_1(%arg0: i32, %arg1: i32) -> (i32, i32) {
    %c0_i32 = arith.constant 0 : i32
    %c0_i32_0 = arith.constant 0 : i32
    %c0_i32_1 = arith.constant 0 : i32
    return %c0_i32, %c0_i32_0 : i32, i32
  }
  func.func @transform_2(%arg0: i32, %arg1: i32) -> (i32, i32) {
    %c0_i32 = arith.constant 0 : i32
    %c0_i32_0 = arith.constant 0 : i32
    %c0_i32_1 = arith.constant 0 : i32
    return %c0_i32, %c0_i32_0 : i32, i32
  }
  func.func @transform_3(%arg0: i32, %arg1: i32) -> (i32, i32) {
    %c0_i32 = arith.constant 0 : i32
    %c0_i32_0 = arith.constant 0 : i32
    %c0_i32_1 = arith.constant 0 : i32
    return %c0_i32, %c0_i32_0 : i32, i32
  }
  func.func @transform_4(%arg0: i32, %arg1: i32) -> (i32, i32) {
    %c0_i32 = arith.constant 0 : i32
    %c0_i32_0 = arith.constant 0 : i32
    %c0_i32_1 = arith.constant 0 : i32
    return %c0_i32, %c0_i32_0 : i32, i32
  }
  func.func @transform_5(%arg0: i32, %arg1: i32) -> (i32, i32) {
    %c0_i32 = arith.constant 0 : i32
    %c0_i32_0 = arith.constant 0 : i32
    %c0_i32_1 = arith.constant 0 : i32
    return %c0_i32, %c0_i32_0 : i32, i32
  }
  func.func @transform_6(%arg0: i32, %arg1: i32) -> (i32, i32) {
    %c0_i32 = arith.constant 0 : i32
    %c0_i32_0 = arith.constant 0 : i32
    %c0_i32_1 = arith.constant 0 : i32
    return %c0_i32, %c0_i32_0 : i32, i32
  }
  func.func @transform_7(%arg0: i32, %arg1: i32) -> (i32, i32, i32) {
    %c0_i32 = arith.constant 0 : i32
    %c0_i32_0 = arith.constant 0 : i32
    return %arg0, %c0_i32, %arg1 : i32, i32, i32
  }
}

</mosaic_0001>

<bundles_post_ra>
// kernel: tpu_custom_call.1
= control target key start
LH: loop header
LB: loop body
LE: loop exit
PB: predicated region body
PF: predicated region fallthrough
CT: control target
= control target key end

     0   :  { %s1690_s0 = inlined_call_operand.vmem [shape: f32[2,2,4,256], index: 0, kind: input, shape index: {}]   ;;  %s1691_s1 = inlined_call_operand.hbm [shape: bf16[8,36], index: 1, kind: input, shape index: {}]   ;;  %s1692_s2 = inlined_call_operand.vmem [shape: f32[8,1], index: 2, kind: input, shape index: {}]   ;;  %s1693_s3 = inlined_call_operand.vmem [shape: bf16[8,72], index: 3, kind: input, shape index: {}]   ;;  %s1694_s4 = inlined_call_operand.vmem [shape: f32[8,1], index: 4, kind: input, shape index: {}]   ;;  %s1695_s5 = inlined_call_operand.vmem [shape: bf16[8,4], index: 5, kind: input, shape index: {}]   ;;  %s1696_s6 = inlined_call_operand.vmem [shape: f32[8,1], index: 6, kind: input, shape index: {}]   ;;  %s1697_s7 = inlined_call_operand.hbm [shape: f32[2,8,256], index: 7, kind: output, shape index: {}]  }
   0x1   :  { %1703 = sst [smem:[#allocation9_spill]] %s1691_s1 }
   0x2   :  { %12 = vsyncpa [#allocation3], 0 }
   0x3   :  { %13 = vsyncpa [#allocation4], 0 }
   0x4   :  { %15 = vsyncpa [#allocation4 + $0x1], 0  ;;  %s1319_s24 = smov 0   ;;  %s1321_s25 = smov 0  }
   0x5   :  { %s1323_s26 = smov 0   ;;  %s1325_s27 = smov 0  }
   0x6   :  { %s1327_s28 = smov 0   ;;  %s1329_s29 = smov 0  }
   0x7   :  { %s1331_s30 = smov 0   ;;  %s1333_s8 = smov 0  }
   0x8 LB: > { %s933_s9 = sadd.s32 4294967295, %s1263_s8   ;;  %s934_s10 = sadd.s32 4294967294, %s1263_s8   ;;  %s1263_s8 = sphi %s1333_s8, %s21_s8   ;;  %s1259_s30 = sphi %s1331_s30, %s1733_s30   ;;  %s1255_s29 = sphi %s1329_s29, %s1732_s29   ;;  %s1251_s28 = sphi %s1327_s28, %s1731_s28   ;;  %s1247_s27 = sphi %s1325_s27, %s1730_s27   ;;  %s1243_s26 = sphi %s1323_s26, %s1729_s26   ;;  %s1239_s25 = sphi %s1321_s25, %s1728_s25   ;;  %s1235_s24 = sphi %s1319_s24, %s1727_s24  }
   0x9   : > { %s30_s11 = sadd.s32 1, %s1255_s29  ;;  %s33_s12 = sadd.s32 1, %s1259_s30 }
   0xa   : > { %p31_p0 = scmp.ge.s32.totalorder %s30_s11, 2  ;;  %s196_s13 = sadd.s32 1, %s1243_s26 }
   0xb   : > { %p206_p1 = scmp.ne.s32.totalorder %s1243_s26, %s1239_s25  ;;  %p207_p2 = scmp.eq.s32.totalorder %s933_s9, 3 }
   0xc   : > { %s1735_s11 = smov (%p31_p0, %s30_s11), 0  ;;  %s1737_s12 = smov (!%p31_p0, %s33_s12), %s1259_s30 }
   0xd   : > { %s192_s14 = ssub.s32 %s1255_s29, %s1735_s11  ;;  %p1371_p3 = por %p207_p2, %p206_p1 }
   0xe   : > { %p35_p4 = scmp.ge.s32.totalorder %s1737_s12, 2  ;;  %p212_p5 = scmp.ne.s32.totalorder %s1239_s25, %s1235_s24 }
   0xf   : > { %p213_p6 = scmp.eq.s32.totalorder %s934_s10, 3  ;;  %p935_p7 = scmp.ge.s32.totalorder %s1263_s8, 1 }
  0x10   : > { %s1739_s12 = smov (%p35_p4, %s1737_s12), 0  ;;  %p220_p9 = scmp.lt.s32.totalorder %s1263_s8, 5 }
  0x11   : > { %1705 = sst [smem:[#allocation8_spill]] %s1739_s12  ;;  %p1380_p8 = por %p213_p6, %p212_p5 }
  0x12   : > { %s191_s17 = ssub.s32 %s1259_s30, %s1739_s12  ;;  %p1387_p10 = pnand %p935_p7, %p220_p9 }
  0x13   : > { %s1706_s16 = scalar_select %p1380_p8, 1, 0 }
  0x14   : > { %s193_s18 = sor.u32 %s192_s14, %s191_s17  ;;  %p1391_p12 = scmp.eq.s32.totalorder %s933_s9, 0 }
  0x15   : > { %p194_p11 = scmp.eq.s32.totalorder %s193_s18, 0  ;;  %p970_p13 = pneg %p1387_p10 }
  0x16   : > { %s1265_s22 = smov [#allocation2]  }
  0x17   : > { %s1398_s21 = scalar_select %p194_p11, %s1243_s26, %s196_s13  }
  0x18   : > { %s233_s23 = sshll.u32 %s1265_s22, 4  ;;  %p971_p0 = pnand %p1391_p12, %p970_p13  ;;  %s234_s23 = int_to_ptr.vmem [resolvable:$true] %s233_s23 }
  0x19   : > { %s1152_s10 = scalar_lea.vmem %s234_s23, 64  ;;  %p1160_p6 = scmp.lt.s32.totalorder %s234_s23, %s234_s23 }
  0x1a   : > { %p1143_p1 = pneg %p971_p0  ;;  %p1153_p2 = scmp.ne.s32.totalorder %s234_s23, %s1152_s10 }
  0x1b   : > { %p1161_p7 = scmp.lt.s32.totalorder %s1152_s10, %s1152_s10 }
  0x1c   : > { %p1155_p4 = pnand %p1153_p2, %p1143_p1 }
  0x1d   : > { %p1162_p9 = por %p1161_p7, %p1160_p6 }
  0x1e   : > { %p1156_p5 = pneg %p1155_p4 }
  0x20   : > { %p1163_p8 = pnand %p1162_p9, %p1156_p5 }
  0x22   : > { %1166 = shalt.err (!%p1163_p8)
}
  0x23   : > { %s1709_s1 = sld [smem:[#allocation9_spill]] }
  0x25   : > { %273 = sbr.rel (%p1387_p10) target bundleno = 880 (0x370), region = 48 }
  0x29   : > { %973 = dma.hbm_to_vmem [thread:$0]  (!%p971_p0), %s1709_s1, 64, %s234_s23, [#allocation3]  }
  0x2a   : > { %1226 = dma.done.wait (%p1391_p12), [#allocation3], 64  }
  0x2b   : > { %1228 = vsyncadd (%p1391_p12), [#allocation3], 4294967232  ;;  %p309_p11 = scmp.lt.s32.totalorder %s1251_s28, 1  ;;  %p311_p13 = scmp.lt.s32.totalorder %s1247_s27, 1  ;;  %v1274_v3 = vmov 0   ;;  %v499_v4 = vld [vmem:[%s1692_s2] sm:$0xff]  ;;  %v322_v5 = vlaneseq }
  0x2c   : > { %s1266_s20 = smov 111   ;;  %s1267_s1 = smov 127   ;;  %547 = vmatprep.mubr.bf16.mxu0 %v1274_v3  ;;  %1098 = vset.pattern.permute.xlu0 %v1274_v3  ;;  %vm1699_vm8 = vcmask 1041408   ;;  %vm470_vm13 = vcmask 1043456   ;;  %vm475_vm14 = vcmask 1045504   ;;  %vm505_vm15 = vcmask 293888  }
  0x2d   : > { %s310_s13 = scalar_select %p309_p11, %s1251_s28, 1  ;;  %739 = vmatprep.mubr.bf16.mxu1 %v1274_v3  ;;  %1139 = vset.pattern.permute.xlu1 %v1274_v3  ;;  %v1429_v6 = vand.u32 127, %v322_v5  ;;  %v750_v14 = vld [vmem:[%s1695_s5] sm:$0xf] }
  0x2e   : > { %s312_s17 = scalar_select %p311_p13, %s1247_s27, 1 }
  0x2f   : > { %s942_s18 = sshll.u32 %s310_s13, 2  ;;  %s1268_s12 = smov 112   ;;  %v1432_v7 = vadd.s32 128, %v1429_v6  ;;  %v325_v8 = vand.u32 15, %v1429_v6  ;;  %vm401_vm0 = vcmp.lt.s32.totalorder %v1429_v6, 127  ;;  %vm423_vm2 = vcmp.lt.s32.totalorder %v1429_v6, 112 }
  0x30   : > { %s941_s22 = sshll.u32 %s312_s17, 1  ;;  %s1269_s13 = smov 113   ;;  %vm412_vm3 = vcmp.lt.s32.totalorder %v1429_v6, 113  ;;  %vm432_vm4 = vcmp.lt.s32.totalorder %v1429_v6, 111  ;;  %vm1701_vm9 = vcmp.lt.s32.totalorder %v1429_v6, 15  ;;  %vm1702_vm10 = vcmp.lt.s32.totalorder %v1429_v6, 16 }
  0x31   : > { %s315_s23 = sadd.s32 %s942_s18, %s941_s22  ;;  %s1270_s17 = smov 15   ;;  %v326_v9 = vand.u32 15, %v1432_v7  ;;  %vm1437_vm1 = vcmp.le.s32.totalorder %v325_v8, 14  ;;  %vm1448_vm6 = vcmp.ge.s32.totalorder %v325_v8, 1  ;;  %vm388_vm11 = vcmp.lt.s32.totalorder %v1429_v6, 1 }
  0x32   : > { %s943_s10 = sshll.u32 %s315_s23, 2  ;;  %s1271_s18 = smov 16   ;;  %vm1700_vm12 = vcmp.lt.s32.totalorder %v1429_v6, 17 }
  0x33   : > { %s317_s14 = scalar_lea.vmem %s1690_s0, %s943_s10  ;;  %s1272_s22 = smov 1   ;;  %vm1444_vm5 = vcmp.le.s32.totalorder %v326_v9, 14  ;;  %vm1452_vm7 = vcmp.ge.s32.totalorder %v326_v9, 1 }
  0x34   : > { %v319_v0 = vld [vmem:[%s317_s14] sm:$0xff]  ;;  %s1273_s23 = smov 17   ;;  %s944_s9 = sshll.u32 %s1247_s27, 3 }
  0x35   : > { %v343_v1 = vcombine.high %v319_v0, %v319_v0  ;;  %v1460_v21 = vpack.c.bf16 %v319_v0, %v319_v0  ;;  %s945_s14 = sadd.s32 4294967294, %s944_s9  ;;  %s1275_s10 = smov 96  }
  0x37   : > { %v1068_v2 = vpack.i.bf16 %v343_v1, %v319_v0  ;;  %v1458_v20 = vpack.c.bf16 %v343_v1, %v343_v1 }
  0x39   : > { %1069 = vrot.lane.b32.xlu1 %v1068_v2, %s1266_s20  ;;  %1059 = vrot.lane.b32.xlu0 %v1068_v2, %s1267_s1 }
  0x3d   : > { %1074 = vrot.lane.b32.xlu1 %v1068_v2, %s1268_s12  ;;  %1064 = vrot.lane.b32.xlu0 %v1068_v2, %s1269_s13 }
  0x41   : > { %1084 = vrot.lane.b32.xlu1 %v1068_v2, %s1270_s17  ;;  %1079 = vrot.lane.b32.xlu0 %v1068_v2, %s1271_s18 }
  0x45   : > { %1094 = vrot.lane.b32.xlu1 %v1068_v2, %s1272_s22  ;;  %1089 = vrot.lane.b32.xlu0 %v1068_v2, %s1273_s23 }
  0x49   : > { %502 = vperm.xlu0 %1098, %v499_v4  }
  0xab   : > { %v1070_v11 = vpop.permute.xlu1 %1069  ;;  %v1060_v13 = vpop.permute.xlu0 %1059 }
  0xac   : > { %v1072_v16 = vunpack.i.h.bf16 %v1070_v11  ;;  %v1071_v17 = vunpack.i.l.bf16 %v1070_v11  ;;  %v1062_v18 = vunpack.i.h.bf16 %v1060_v13  ;;  %v1061_v19 = vunpack.i.l.bf16 %v1060_v13 }
  0xae   : > { %v402_v22 = vsel %vm401_vm0, %v1061_v19, %v1062_v18  ;;  %v403_v23 = vsel %vm401_vm0, %v1062_v18, %v1061_v19  ;;  %v434_v24 = vsel %vm432_vm4, %v1072_v16, %v1071_v17  ;;  %v433_v25 = vsel %vm432_vm4, %v1071_v17, %v1072_v16 }
  0xaf   : > { %v404_v26 = vsel %vm1437_vm1, %v402_v22, 0.0  ;;  %v405_v27 = vsel %vm1444_vm5, %v403_v23, 0.0  ;;  %v1075_v28 = vpop.permute.xlu1 %1074  ;;  %v1065_v29 = vpop.permute.xlu0 %1064  ;;  %v436_v30 = vsel %vm1444_vm5, %v434_v24, 0.0  ;;  %v435_v31 = vsel %vm1437_vm1, %v433_v25, 0.0 }
  0xb0   : > { %v406_v32 = vpack.c.bf16 %v404_v26, %v404_v26  ;;  %v407_v33 = vpack.c.bf16 %v405_v27, %v405_v27  ;;  %v1077_v34 = vunpack.i.h.bf16 %v1075_v28  ;;  %v1076_v35 = vunpack.i.l.bf16 %v1075_v28 }
  0xb1   : > { %v1067_v36 = vunpack.i.h.bf16 %v1065_v29  ;;  %v1066_v37 = vunpack.i.l.bf16 %v1065_v29  ;;  %v438_v38 = vpack.c.bf16 %v436_v30, %v436_v30  ;;  %v437_v39 = vpack.c.bf16 %v435_v31, %v435_v31 }
  0xb2   : > { %v453_v40 = vrot.slane %v406_v32, 6  ;;  %v454_v41 = vrot.slane %v407_v33, 6  ;;  %v425_v42 = vsel %vm423_vm2, %v1077_v34, %v1076_v35  ;;  %v424_v43 = vsel %vm423_vm2, %v1076_v35, %v1077_v34 }
  0xb3   : > { %v427_v44 = vpack.c.bf16 %v425_v42, %v425_v42  ;;  %v413_v45 = vsel %vm412_vm3, %v1066_v37, %v1067_v36  ;;  %v414_v46 = vsel %vm412_vm3, %v1067_v36, %v1066_v37  ;;  %946 = vmatprep.subr.msk.bf16.mxu0 %vm1699_vm8, %v438_v38  ;;  %v1085_v47 = vpop.permute.xlu1 %1084  ;;  %v1080_v48 = vpop.permute.xlu0 %1079  ;;  %v510_v55 = vsel %vm1699_vm8, %v437_v39, 0 }
  0xb4   : > { %v415_v49 = vsel %vm1448_vm6, %v413_v45, 0.0  ;;  %v416_v50 = vsel %vm1452_vm7, %v414_v46, 0.0  ;;  %v1087_v51 = vunpack.i.h.bf16 %v1085_v47  ;;  %v1086_v52 = vunpack.i.l.bf16 %v1085_v47  ;;  %526 = vmatpush1.bf16.msra.mxu0 %v510_v55 }
  0xb5   : > { %v417_v53 = vpack.c.bf16 %v415_v49, %v415_v49  ;;  %v418_v54 = vpack.c.bf16 %v416_v50, %v416_v50  ;;  %v1082_v56 = vunpack.i.h.bf16 %v1080_v48  ;;  %v426_v57 = vpack.c.bf16 %v424_v43, %v424_v43 }
  0xb6   : > { %v374_v58 = vsel %vm1701_vm9, %v1086_v52, %v1087_v51  ;;  %v375_v59 = vsel %vm1701_vm9, %v1087_v51, %v1086_v52  ;;  %v1081_v60 = vunpack.i.l.bf16 %v1080_v48  ;;  %v462_v2 = vrot.slane %v427_v44, 2 }
  0xb7   : > { %v457_v61 = vrot.slane %v417_v53, 4  ;;  %v380_v62 = vsel %vm1437_vm1, %v375_v59, 0.0  ;;  %v381_v63 = vsel %vm1444_vm5, %v374_v58, 0.0  ;;  %v1095_v0 = vpop.permute.xlu1 %1094  ;;  %v1090_v1 = vpop.permute.xlu0 %1089  ;;  %v458_v3 = vrot.slane %v418_v54, 4  ;;  %v498_v53 = vld [vmem:[#allocation2] sm:$0xf] }
  0xb8   : > { %v382_v4 = vpack.c.bf16 %v380_v62, %v380_v62  ;;  %v365_v5 = vsel %vm1702_vm10, %v1081_v60, %v1082_v56  ;;  %v366_v8 = vsel %vm1702_vm10, %v1082_v56, %v1081_v60  ;;  %v1097_v13 = vunpack.i.h.bf16 %v1095_v0 }
  0xb9   : > { %v367_v9 = vpack.c.bf16 %v366_v8, %v366_v8  ;;  %v368_v11 = vpack.c.bf16 %v365_v5, %v365_v5  ;;  %v1096_v16 = vunpack.i.l.bf16 %v1095_v0  ;;  %v383_v17 = vpack.c.bf16 %v381_v63, %v381_v63  ;;  %v691_v8 = vld [vmem:[%s1694_s4] sm:$0xff] }
  0xba   : > { %v445_v18 = vrot.slane %v382_v4, 4  ;;  %v1092_v19 = vunpack.i.h.bf16 %v1090_v1  ;;  %v1091_v22 = vunpack.i.l.bf16 %v1090_v1  ;;  %v487_v29 = vsel %vm1699_vm8, %v1458_v20, %v454_v41 }
  0xbb   : > { %v441_v23 = vrot.slane %v367_v9, 6  ;;  %v442_v24 = vrot.slane %v368_v11, 6  ;;  %v389_v25 = vsel %vm388_vm11, %v1096_v16, %v1097_v13  ;;  %v390_v26 = vsel %vm388_vm11, %v1097_v13, %v1096_v16 }
  0xbc   : > { %v350_v27 = vsel %vm1700_vm12, %v1091_v22, %v1092_v19  ;;  %v351_v28 = vsel %vm1700_vm12, %v1092_v19, %v1091_v22  ;;  %v461_v30 = vrot.slane %v426_v57, 2  ;;  %v491_v33 = vsel %vm470_vm13, %v487_v29, %v458_v3 }
  0xbd   : > { %v356_v31 = vsel %vm1448_vm6, %v351_v28, 0.0  ;;  %v357_v32 = vsel %vm1452_vm7, %v350_v27, 0.0  ;;  %v484_v34 = vsel %vm1699_vm8, %v1460_v21, %v453_v40  ;;  %v496_v37 = vsel %vm475_vm14, %v491_v33, %v462_v2 }
  0xbe   : > { %v358_v35 = vpack.c.bf16 %v356_v31, %v356_v31  ;;  %v359_v36 = vpack.c.bf16 %v357_v32, %v357_v32  ;;  %v489_v38 = vsel %vm470_vm13, %v484_v34, %v457_v61  ;;  %v446_v39 = vrot.slane %v383_v17, 4  ;;  %527 = vmatprep.subr.bf16.mxu0 %v496_v37 }
  0xbf   : > { %v493_v41 = vsel %vm475_vm14, %v489_v38, %v461_v30  ;;  %v392_v42 = vsel %vm1452_vm7, %v389_v25, 0.0  ;;  %v391_v43 = vsel %vm1448_vm6, %v390_v26, 0.0  ;;  %v327_v54 = vshra.s32 %v1429_v6, 4 }
  0xc0   : > { %528 = vmatpush1.bf16.msra.mxu0 %v493_v41  ;;  %v394_v44 = vpack.c.bf16 %v392_v42, %v392_v42  ;;  %v469_v40 = vsel %vm1699_vm8, %v359_v36, %v442_v24  ;;  %v393_v45 = vpack.c.bf16 %v391_v43, %v391_v43  ;;  %v466_v46 = vsel %vm1699_vm8, %v358_v35, %v441_v23 }
  0xc1   : > { %v474_v47 = vsel %vm470_vm13, %v469_v40, %v446_v39  ;;  %v472_v48 = vsel %vm470_vm13, %v466_v46, %v445_v18  ;;  %v333_v55 = vstv %s945_s14  ;;  %v328_v56 = vshra.s32 %v1432_v7, 4  ;;  %s952_s14 = sshll.u32 %s1251_s28, 1 }
  0xc2   : > { %v450_v49 = vrot.slane %v394_v44, 2  ;;  %v449_v50 = vrot.slane %v393_v45, 2  ;;  %v334_v57 = vadd.s32 %v333_v55, %v327_v54  ;;  %v1276_v9 = vmov 0.0   ;;  %s836_s19 = sadd.s32 %s1247_s27, %s952_s14  ;;  %s1278_s27 = smov [#allocation5]  }
  0xc3   : > { %v335_v58 = vadd.s32 %v333_v55, %v328_v56  ;;  %s953_s9 = sshll.u32 %s836_s19, 7 }
  0xc4   : > { %v480_v51 = vsel %vm475_vm14, %v474_v47, %v450_v49  ;;  %v477_v52 = vsel %vm475_vm14, %v472_v48, %v449_v50  ;;  %v503_v59 = vpop.permute.xlu0 %502  ;;  %vm336_vm8 = vcmp.ge.s32.totalorder %v334_v57, 0  ;;  %vm338_vm12 = vcmp.lt.s32.totalorder %v334_v57, 16 }
  0xc5   : > { %529 = vmatprep.subr.bf16.mxu0 %v480_v51  ;;  %vm337_vm14 = vcmp.ge.s32.totalorder %v335_v58, 0  ;;  %vm339_vm9 = vcmp.lt.s32.totalorder %v335_v58, 16  ;;  %vm340_vm10 = vmand %vm336_vm8, %vm338_vm12  ;;  %vm1277_vm8 = vmmov 0  }
  0xc6   : > { %530 = vmatpush1.bf16.msra.mxu0 %v477_v52 }
  0xc7   : > { %958 = vmatprep.subr.bf16.mxu0 %v1276_v9 }
  0xc9   : > { %947 = vmatmul.mubr.msk.bf16.vlgmr.msra.gmra.mxu0 %vm505_vm15, %v498_v53  ;;  %vm341_vm15 = vmand %vm337_vm14, %vm339_vm9  ;;  %vm763_vm9 = vcmask 785408  }
  0xca   : > { %960 = vmatprep.mubr.msk.bf16.mxu0 %vm1277_vm8, %v1276_v9 }
 0x189   : > { %v549_v60 = vpop.f32.mrf.mxu0 }
 0x18a   : > { %v550_v61 = vadd.f32 %v549_v60, %v503_v59 }
 0x18b   : > { %v551_v62 = vpop.f32.mrf.mxu0 }
 0x18c   : > { %v556_v63 = vmax.f32 %v550_v61, 0.0  ;;  %v552_v0 = vadd.f32 %v551_v62, %v503_v59 }
 0x18d   : > { %v553_v1 = vpop.f32.mrf.mxu0 }
 0x18e   : > { %v557_v2 = vmax.f32 %v552_v0, 0.0  ;;  %v1539_v4 = vsel %vm340_vm10, %v556_v63, 0.0  ;;  %vm1722_vm10 = vcmp.lt.s32.totalorder %v1429_v6, 17 }
 0x18f   : > { %v554_v3 = vpop.f32.mrf.mxu0  ;;  %v602_v36 = vpack.c.bf16 %v1539_v4, %v1539_v4 }
 0x190   : > { %v1541_v7 = vsel %vm341_vm15, %v557_v2, 0.0 }
 0x191   : > { %v1109_v5 = vpack.i.bf16 %v1541_v7, %v1539_v4  ;;  %v603_v63 = vpack.c.bf16 %v1541_v7, %v1541_v7 }
 0x193   : > { %1110 = vrot.lane.b32.xlu0 %v1109_v5, %s1269_s13  ;;  %1100 = vrot.lane.b32.xlu1 %v1109_v5, %s1266_s20 }
 0x197   : > { %1120 = vrot.lane.b32.xlu0 %v1109_v5, %s1272_s22  ;;  %1105 = vrot.lane.b32.xlu1 %v1109_v5, %s1268_s12  ;;  %s306_s22 = sand.u32 1, %s1239_s25  }
 0x19b   : > { %1130 = vrot.lane.b32.xlu0 %v1109_v5, %s1271_s18  ;;  %1115 = vrot.lane.b32.xlu1 %v1109_v5, %s1267_s1  ;;  %s1171_s18 = sshll.u32 %s1278_s27, 4  ;;  %s1172_s18 = int_to_ptr.vmem [resolvable:$false] %s1171_s18 }
 0x19c   : > { %s1173_s14 = scalar_lea.vmem %s1172_s18, 256 }
 0x19f   : > { %759 = vrot.lane.b32.xlu0 %v1460_v21, %s1275_s10  ;;  %1125 = vrot.lane.b32.xlu1 %v1109_v5, %s1270_s17  ;;  %v751_v21 = vld [vmem:[%s1696_s6] sm:$0xff]  ;;  %s825_s17 = scalar_lea.sflag [#allocation4], %s306_s22 }
 0x1a3   : > { %694 = vperm.xlu0 %1098, %v691_v8   ;;  %1135 = vrot.lane.b32.xlu1 %v1109_v5, %s1273_s23  ;;  %s940_s23 = sshll.u32 %s306_s22, 3 }
 0x1a4   : > { %s308_s1 = scalar_lea.vmem [#allocation5], %s940_s23 }
 0x1a5   : > { %s840_s12 = sshll.u32 %s308_s1, 4  ;;  %s841_s12 = int_to_ptr.vmem [resolvable:$true] %s840_s12 }
 0x1a6   : > { %s1167_s28 = scalar_lea.vmem %s841_s12, 128  ;;  %p1174_p0 = scmp.lt.s32.totalorder %s841_s12, %s1172_s18 }
 0x1a7   : > { %761 = vrot.lane.b32.xlu1 %v1458_v20, %s1275_s10  ;;  %p1168_p8 = scmp.ne.s32.totalorder %s841_s12, %s1167_s28  ;;  %p1175_p1 = scmp.lt.s32.totalorder %s1173_s14, %s1167_s28 }
 0x1a9   : > { %p1169_p10 = pnand %p1168_p8, %p1371_p3  ;;  %p1176_p2 = por %p1175_p1, %p1174_p0 }
 0x1ab   : > { %754 = vperm.xlu1 %1139, %v751_v21   ;;  %p1170_p12 = pneg %p1169_p10 }
 0x1ad   : > { %p1177_p4 = pnand %p1176_p2, %p1170_p12 }
 0x205   : > { %v1111_v11 = vpop.permute.xlu0 %1110  ;;  %v1101_v13 = vpop.permute.xlu1 %1100 }
 0x206   : > { %v1113_v16 = vunpack.i.h.bf16 %v1111_v11  ;;  %v1112_v17 = vunpack.i.l.bf16 %v1111_v11  ;;  %v1103_v18 = vunpack.i.h.bf16 %v1101_v13  ;;  %v1102_v19 = vunpack.i.l.bf16 %v1101_v13 }
 0x208   : > { %v619_v22 = vsel %vm412_vm3, %v1113_v16, %v1112_v17  ;;  %v637_v23 = vsel %vm432_vm4, %v1103_v18, %v1102_v19  ;;  %v636_v20 = vsel %vm432_vm4, %v1102_v19, %v1103_v18  ;;  %v618_v24 = vsel %vm412_vm3, %v1112_v17, %v1113_v16 }
 0x209   : > { %v1121_v25 = vpop.permute.xlu0 %1120  ;;  %v1106_v26 = vpop.permute.xlu1 %1105  ;;  %v639_v27 = vsel %vm1444_vm5, %v637_v23, 0.0  ;;  %v638_v28 = vsel %vm1437_vm1, %v636_v20, 0.0  ;;  %v621_v35 = vsel %vm1452_vm7, %v619_v22, 0.0  ;;  %v620_v41 = vsel %vm1448_vm6, %v618_v24, 0.0 }
 0x20a   : > { %v1123_v29 = vunpack.i.h.bf16 %v1121_v25  ;;  %v1122_v30 = vunpack.i.l.bf16 %v1121_v25  ;;  %v1108_v31 = vunpack.i.h.bf16 %v1106_v26  ;;  %v1107_v32 = vunpack.i.l.bf16 %v1106_v26 }
 0x20b   : > { %v641_v33 = vpack.c.bf16 %v639_v27, %v639_v27  ;;  %v640_v34 = vpack.c.bf16 %v638_v28, %v638_v28  ;;  %v623_v51 = vpack.c.bf16 %v621_v35, %v621_v35  ;;  %v622_v53 = vpack.c.bf16 %v620_v41, %v620_v41 }
 0x20c   : > { %v596_v37 = vsel %vm388_vm11, %v1122_v30, %v1123_v29  ;;  %v628_v38 = vsel %vm423_vm2, %v1107_v32, %v1108_v31  ;;  %v629_v39 = vsel %vm423_vm2, %v1108_v31, %v1107_v32  ;;  %v597_v55 = vsel %vm388_vm11, %v1123_v29, %v1122_v30  ;;  %vm1723_vm11 = vmmov %vm1722_vm10 }
 0x20d   : > { %v630_v42 = vpack.c.bf16 %v628_v38, %v628_v38  ;;  %v631_v43 = vpack.c.bf16 %v629_v39, %v629_v39  ;;  %948 = vmatprep.subr.msk.bf16.mxu1 %vm470_vm13, %v641_v33  ;;  %v1131_v44 = vpop.permute.xlu0 %1130  ;;  %v1116_v40 = vpop.permute.xlu1 %1115  ;;  %v702_v45 = vsel %vm470_vm13, %v640_v34, 0  ;;  %v599_v46 = vsel %vm1452_vm7, %v596_v37, 0.0 }
 0x20e   : > { %v1133_v47 = vunpack.i.h.bf16 %v1131_v44  ;;  %v1132_v48 = vunpack.i.l.bf16 %v1131_v44  ;;  %v1118_v49 = vunpack.i.h.bf16 %v1116_v40  ;;  %v1117_v50 = vunpack.i.l.bf16 %v1116_v40  ;;  %714 = vmatpush1.bf16.msra.mxu1 %v702_v45  ;;  %v690_v44 = vld [vmem:[%s1693_s3] sm:$0xf] }
 0x20f   : > { %v657_v52 = vrot.slane %v631_v43, 4  ;;  %v656_v54 = vrot.slane %v630_v42, 4  ;;  %v601_v58 = vpack.c.bf16 %v599_v46, %v599_v46  ;;  %vm1718_vm2 = vcmp.lt.s32.totalorder %v1429_v6, 16 }
 0x210   : > { %v608_v56 = vsel %vm401_vm0, %v1117_v50, %v1118_v49  ;;  %v609_v57 = vsel %vm401_vm0, %v1118_v49, %v1117_v50  ;;  %v578_v59 = vsel %vm1718_vm2, %v1132_v48, %v1133_v47  ;;  %vm1719_vm0 = vmmov %vm1718_vm2  ;;  %v598_v9 = vsel %vm1448_vm6, %v597_v55, 0.0 }
 0x211   : > { %v1126_v60 = vpop.permute.xlu1 %1125  ;;  %v688_v61 = vsel %vm470_vm13, %v623_v51, %v657_v52  ;;  %v684_v62 = vsel %vm470_vm13, %v622_v53, %v656_v54  ;;  %v611_v2 = vsel %vm1444_vm5, %v609_v57, 0.0  ;;  %v610_v3 = vsel %vm1437_vm1, %v608_v56, 0.0  ;;  %v760_v31 = vpop.permute.xlu0 %759 }
 0x212   : > { %v1128_v0 = vunpack.i.h.bf16 %v1126_v60  ;;  %v1127_v1 = vunpack.i.l.bf16 %v1126_v60  ;;  %715 = vmatprep.subr.bf16.mxu1 %v688_v61  ;;  %v579_v4 = vsel %vm1719_vm0, %v1133_v47, %v1132_v48  ;;  %v613_v5 = vpack.c.bf16 %v611_v2, %v611_v2 }
 0x213   : > { %716 = vmatpush1.bf16.msra.mxu1 %v684_v62  ;;  %v612_v8 = vpack.c.bf16 %v610_v3, %v610_v3  ;;  %v581_v21 = vpack.c.bf16 %v578_v59, %v578_v59  ;;  %vm1720_vm3 = vcmp.lt.s32.totalorder %v1429_v6, 15  ;;  %v649_v13 = vrot.slane %v601_v58, 4 }
 0x214   : > { %v586_v7 = vsel %vm1720_vm3, %v1127_v1, %v1128_v0  ;;  %vm1721_vm4 = vmmov %vm1720_vm3  ;;  %v653_v17 = vrot.slane %v613_v5, 4  ;;  %v600_v25 = vpack.c.bf16 %v598_v9, %v598_v9  ;;  %v580_v30 = vpack.c.bf16 %v579_v4, %v579_v4 }
 0x215   : > { %v587_v11 = vsel %vm1721_vm4, %v1128_v0, %v1127_v1  ;;  %v1136_v16 = vpop.permute.xlu1 %1135  ;;  %v652_v18 = vrot.slane %v612_v8, 4  ;;  %v589_v19 = vsel %vm1444_vm5, %v586_v7, 0.0  ;;  %v645_v37 = vrot.slane %v581_v21, 4 }
 0x216   : > { %v588_v22 = vsel %vm1437_vm1, %v587_v11, 0.0  ;;  %v1138_v23 = vunpack.i.h.bf16 %v1136_v16  ;;  %v1137_v20 = vunpack.i.l.bf16 %v1136_v16  ;;  %v591_v24 = vpack.c.bf16 %v589_v19, %v589_v19 }
 0x217   : > { %v680_v26 = vsel %vm470_vm13, %v603_v63, %v653_v17  ;;  %v676_v27 = vsel %vm470_vm13, %v602_v36, %v652_v18  ;;  %v590_v10 = vpack.c.bf16 %v588_v22, %v588_v22  ;;  %v648_v35 = vrot.slane %v600_v25, 4 }
 0x218   : > { %v568_v28 = vsel %vm1722_vm10, %v1137_v20, %v1138_v23  ;;  %v569_v29 = vsel %vm1723_vm11, %v1138_v23, %v1137_v20  ;;  %717 = vmatprep.subr.bf16.mxu1 %v680_v26  ;;  %v672_v12 = vsel %vm470_vm13, %v591_v24, %v649_v13  ;;  %vm1724_vm1 = vcmask 1041408  }
 0x219   : > { %718 = vmatpush1.bf16.msra.mxu1 %v676_v27  ;;  %v571_v32 = vsel %vm1452_vm7, %v568_v28, 0.0  ;;  %v570_v33 = vsel %vm1448_vm6, %v569_v29, 0.0  ;;  %v762_v34 = vpop.permute.xlu1 %761  ;;  %v668_v39 = vsel %vm470_vm13, %v590_v10, %v648_v35  ;;  %vm765_vm5 = vcmask 31744  }
 0x21a   : > { %719 = vmatprep.subr.bf16.mxu1 %v672_v12  ;;  %v573_v36 = vpack.c.bf16 %v571_v32, %v571_v32  ;;  %v764_v6 = vsel %vm763_vm9, %v760_v31, %v762_v34  ;;  %v572_v42 = vpack.c.bf16 %v570_v33, %v570_v33  ;;  %v644_v15 = vrot.slane %v580_v30, 4 }
 0x21b   : > { %v770_v38 = vsel %vm1724_vm1, %v764_v6, 0  ;;  %vm697_vm6 = vcmask 588800  }
 0x21c   : > { %v664_v41 = vsel %vm470_vm13, %v573_v36, %v645_v37  ;;  %959 = vmatpush3.bf16.msra.mxu0 %v770_v38  ;;  %v660_v43 = vsel %vm470_vm13, %v572_v42, %v644_v15 }
 0x21d   : > { %720 = vmatpush1.bf16.msra.mxu1 %v668_v39 }
 0x21e   : > { %721 = vmatprep.subr.bf16.mxu1 %v664_v41  ;;  %v695_v47 = vpop.permute.xlu0 %694 }
 0x21f   : > { %961 = vmatmul.mubr.msk.bf16.vlgmr.msra.gmra.mxu0 %vm765_vm5, %v750_v14 }
 0x221   : > { %722 = vmatpush1.bf16.msra.mxu1 %v660_v43 }
 0x224   : > { %949 = vmatmul.mubr.msk.bf16.vlgmr.msra.gmra.mxu1 %vm697_vm6, %v690_v44 }
 0x226   : > { %v755_v57 = vpop.permute.xlu1 %754 }
 0x2df   : > { %v806_v40 = vpop.f32.mrf.mxu0 }
 0x2e0   : > { %v807_v58 = vadd.f32 %v806_v40, %v755_v57 }
 0x2e1   : > { %v962_v45 = vpop.f32.mrf.mxu0 }
 0x2e3   : > { %v809_v46 = vpop.f32.mrf.mxu0 }
 0x2e4   : > { %v741_v48 = vpop.f32.mrf.mxu1 }
 0x2e5   : > { %v742_v49 = vadd.f32 %v741_v48, %v695_v47  ;;  %v963_v50 = vpop.f32.mrf.mxu0 }
 0x2e6   : > { %v743_v51 = vpop.f32.mrf.mxu1 }
 0x2e7   : > { %v748_v52 = vmax.f32 %v742_v49, 0.0  ;;  %v744_v53 = vadd.f32 %v743_v51, %v695_v47 }
 0x2e8   : > { %v745_v54 = vpop.f32.mrf.mxu1 }
 0x2e9   : > { %v749_v55 = vmax.f32 %v744_v53, 0.0  ;;  %814 = vrot.lane.b32.xlu0 %v748_v52, %s1275_s10 }
 0x2ea   : > { %v746_v56 = vpop.f32.mrf.mxu1 }
 0x2eb   : > { %816 = vrot.lane.b32.xlu1 %v749_v55, %s1275_s10  ;;  %s838_s10 = scalar_lea.hbm %s1697_s7, %s953_s9 }
 0x35b   : > { %v815_v59 = vpop.permute.xlu0 %814 }
 0x35d   : > { %v817_v60 = vpop.permute.xlu1 %816 }
 0x35e   : > { %v819_v61 = vsel %vm763_vm9, %v815_v59, %v817_v60 }
 0x35f   : > { %v821_v62 = vadd.f32 %v819_v61, %v807_v58 }
 0x361   : > { %v822_v63 = vmax.f32 %v821_v62, 0.0 }
 0x363   : > { %823 = vst [vmem:[%s308_s1] sm:$0xff] %v822_v63 }
 0x364   : > { %1180 = shalt.err (!%p1177_p4)
}
 0x365   : > { %s1181_s23 = scalar_lea.hbm %s838_s10, 128  ;;  %s1185_s9 = scalar_lea.hbm %s1697_s7, 512 }
 0x366   : > { %p1182_p5 = scmp.ne.s32.totalorder %s838_s10, %s1181_s23  ;;  %p1186_p9 = scmp.lt.s32.totalorder %s838_s10, %s1697_s7 }
 0x367   : > { %p1187_p11 = scmp.lt.s32.totalorder %s1185_s9, %s1181_s23 }
 0x368   : > { %p1183_p6 = pnand %p1182_p5, %p1371_p3 }
 0x369   : > { %p1188_p13 = por %p1187_p11, %p1186_p9 }
 0x36a   : > { %p1184_p7 = pneg %p1183_p6 }
 0x36c   : > { %p1189_p8 = pnand %p1188_p13, %p1184_p7 }
 0x36e   : > { %1192 = shalt.err (!%p1189_p8)
}
 0x36f   : > { %968 = dma.vmem_to_hbm [thread:$0]  (%p1371_p3), %s841_s12, 128, %s838_s10, %s825_s17  }
 0x370 PF: > { %p980_p10 = scmp.ge.s32.totalorder %s1263_s8, 2  ;;  %s852_s13 = sand.u32 1, %s1235_s24  }
 0x371   : > { %p1725_p12 = scmp.ne.s32.totalorder %s1706_s16, 0  ;;  %s853_s28 = scalar_lea.sflag [#allocation4], %s852_s13 }
 0x373   : > { %p975_p0 = pnand %p980_p10, %p1725_p12 }
 0x375   : > { %p976_p1 = pneg %p975_p0 }
 0x377   : > { %1230 = dma.done.wait (%p976_p1), %s853_s28, 128  }
 0x378   : > { %1232 = vsyncadd (%p976_p1), %s853_s28, 4294967168  ;;  %s21_s8 = sadd.s32 1, %s1263_s8   ;;  %s1726_s15 = sld [smem:[#allocation8_spill]] }
 0x379   : > { %p18_p2 = scmp.ge.s32.totalorder %s21_s8, 6   ;;  %s1727_s24 = smov %s1239_s25 }
 0x37a   : > { %s1728_s25 = smov %s1243_s26  ;;  %s1729_s26 = smov %s1398_s21 }
 0x37b   : > { %s1730_s27 = smov %s1255_s29  ;;  %s1731_s28 = smov %s1259_s30 }
 0x37c   : > { %s1732_s29 = smov %s1735_s11  ;;  %20 = sbr.rel (!%p18_p2) target bundleno = 8 (0x8), region = 88 }
 0x37e   : > { %s1733_s30 = smov %s1726_s15 }
 0x381   :  { %858 = vsyncpa [#allocation3], 1 }
 0x382   :  { %860 = vsyncpa [#allocation3 + $0x1], 1 }
 0x383   :  { %861 = vsyncpa [#allocation4], 1 }
 0x384   :  { %863 = vsyncpa [#allocation4 + $0x1], 1 }

</bundles_post_ra>
